<compile_context>
chip_gen: v6e
topology: v6e:2x2x1
jax: 0.10.0
libtpu: 0.0.40
codegen_flags: <defaults>
</compile_context>

<pallas_src>
import functools

import jax
import jax.numpy as jnp
from jax.experimental import pallas as pl
from jax.experimental.pallas import tpu as pltpu

_VMEM_LIMIT = 48 * 1024 * 1024  # headroom on v7x (64 MiB) / v6e / v5e


# ----------------------------------------------------------------------------
# helpers
# ----------------------------------------------------------------------------
def _round_up(x, m):
    return ((x + m - 1) // m) * m


def _tile_and_pad(dim, target, align):
    """Returns (tile, padded_dim): tile is align-multiple (or full padded dim),
    padded_dim is a multiple of tile."""
    padded = _round_up(dim, align)
    if padded <= target:
        return padded, padded
    return target, _round_up(dim, target)


# ----------------------------------------------------------------------------
# Pallas kernels
# ----------------------------------------------------------------------------
def _linear_kernel(x_ref, w_ref, b_ref, o_ref, acc_ref, *, activation):
    """Tiled y = x @ w + b (K-reduction over grid axis 2), fused activation."""
    @pl.when(pl.program_id(2) == 0)
    def _():
        acc_ref[...] = jnp.zeros_like(acc_ref)

    acc_ref[...] += jnp.dot(x_ref[...], w_ref[...],
                            preferred_element_type=jnp.float32)

    @pl.when(pl.program_id(2) == pl.num_programs(2) - 1)
    def _():
        y = acc_ref[...] + b_ref[...]
        if activation == "relu":
            y = jnp.maximum(y, 0.0)
        elif activation == "tanh":
            y = jnp.tanh(y)
        o_ref[...] = y.astype(o_ref.dtype)


def pallas_linear(x, w, b=None, activation="none",
                  tm_target=256, tn_target=256, tk_target=512):
    """x: (M, K), w: (K, N), b: (N,) -> (M, N) f32.  bf16 MXU operands."""
    M, K = x.shape
    Kw, N = w.shape
    assert K == Kw, (K, Kw)
    if b is None:
        b = jnp.zeros((N,), jnp.float32)
    tm, Mp = _tile_and_pad(M, tm_target, 8)
    tn, Np = _tile_and_pad(N, tn_target, 128)
    tk, Kp = _tile_and_pad(K, tk_target, 128)
    xp = jnp.pad(x.astype(jnp.bfloat16), ((0, Mp - M), (0, Kp - K)))
    wp = jnp.pad(w.astype(jnp.bfloat16), ((0, Kp - K), (0, Np - N)))
    bp = jnp.pad(b.astype(jnp.float32), (0, Np - N)).reshape(1, Np)

    out = pl.pallas_call(
        functools.partial(_linear_kernel, activation=activation),
        out_shape=jax.ShapeDtypeStruct((Mp, Np), jnp.float32),
        grid=(Mp // tm, Np // tn, Kp // tk),
        in_specs=[
            pl.BlockSpec((tm, tk), lambda i, j, k: (i, k)),
            pl.BlockSpec((tk, tn), lambda i, j, k: (k, j)),
            pl.BlockSpec((1, tn), lambda i, j, k: (0, j)),
        ],
        out_specs=pl.BlockSpec((tm, tn), lambda i, j, k: (i, j)),
        scratch_shapes=[pltpu.VMEM((tm, tn), jnp.float32)],
        compiler_params=pltpu.CompilerParams(
            dimension_semantics=("parallel", "parallel", "arbitrary"),
            vmem_limit_bytes=_VMEM_LIMIT),
    )(xp, wp, bp)
    return out[:M, :N]


def _bmm_kernel(a_ref, b_ref, o_ref, acc_ref):
    @pl.when(pl.program_id(3) == 0)
    def _():
        acc_ref[...] = jnp.zeros_like(acc_ref)

    acc_ref[...] += jnp.dot(a_ref[0], b_ref[0],
                            preferred_element_type=jnp.float32)

    @pl.when(pl.program_id(3) == pl.num_programs(3) - 1)
    def _():
        o_ref[0] = acc_ref[...].astype(o_ref.dtype)


def pallas_bmm(a, b, tm_target=256, tn_target=256, tk_target=512):
    """Batched matmul (B, M, K) @ (B, K, N) -> (B, M, N) f32."""
    B, M, K = a.shape
    _, Kb, N = b.shape
    assert K == Kb, (K, Kb)
    tm, Mp = _tile_and_pad(M, tm_target, 8)
    tn, Np = _tile_and_pad(N, tn_target, 128)
    tk, Kp = _tile_and_pad(K, tk_target, 128)
    ap = jnp.pad(a.astype(jnp.bfloat16), ((0, 0), (0, Mp - M), (0, Kp - K)))
    bp = jnp.pad(b.astype(jnp.bfloat16), ((0, 0), (0, Kp - K), (0, Np - N)))

    out = pl.pallas_call(
        _bmm_kernel,
        out_shape=jax.ShapeDtypeStruct((B, Mp, Np), jnp.float32),
        grid=(B, Mp // tm, Np // tn, Kp // tk),
        in_specs=[
            pl.BlockSpec((1, tm, tk), lambda bi, i, j, k: (bi, i, k)),
            pl.BlockSpec((1, tk, tn), lambda bi, i, j, k: (bi, k, j)),
        ],
        out_specs=pl.BlockSpec((1, tm, tn), lambda bi, i, j, k: (bi, i, j)),
        scratch_shapes=[pltpu.VMEM((tm, tn), jnp.float32)],
        compiler_params=pltpu.CompilerParams(
            dimension_semantics=("parallel", "parallel", "parallel", "arbitrary"),
            vmem_limit_bytes=_VMEM_LIMIT),
    )(ap, bp)
    return out[:, :M, :N]


def _enhance_reason_kernel(s_ref, c_ref, wf_ref, bf_ref, wl_ref, bl_ref,
                           pair_ref, y_ref, *, n_layers):
    """Fused Enhance_entity/mention gate + Enhance_*_pair reasoning stack.

    Reference computes feat_s = fusion(mix) and feat_c = fusion(mix) with the
    SAME module, so feat_s == feat_c and feat_sc = 2*feat_s: one matmul suffices
    and the sigmoid gate rides in the epilogue.  The 3x (linear+ReLU)+residual
    stack then runs on the gated "pair" without it leaving VMEM."""
    s = s_ref[...]
    c = c_ref[...]
    mix = (s + c).astype(jnp.bfloat16)
    fs = jnp.tanh(jnp.dot(mix, wf_ref[...], preferred_element_type=jnp.float32)
                  + bf_ref[...])
    gate = jax.nn.sigmoid(2.0 * fs)
    pair = s * (1.0 - gate) + c * gate
    pair_ref[...] = pair

    wl = wl_ref[...]
    bl = bl_ref[...]
    y = pair
    for _ in range(n_layers):  # statically unrolled
        y = jnp.maximum(jnp.dot(y.astype(jnp.bfloat16), wl,
                                preferred_element_type=jnp.float32) + bl, 0.0)
    y_ref[...] = y + pair


def pallas_enhance_and_reason(feat_struc, feat_context, Wf, bf, Wl, bl,
                              n_layers=3, tm_target=256):
    # TODO(synk): BiLstm_reason(1536, 768) definition not provided; substituted
    # with a linear(E->E)+tanh (fusion) / linear(E->E) (lstm_reason_e) of
    # matching I/O shape, with the reference's shared weights and ReLU chain.
    B, N, E = feat_struc.shape
    M = B * N
    Ep = _round_up(E, 128)              # lane-dense output blocks
    tm, Mp = _tile_and_pad(M, tm_target, 8)
    s = jnp.pad(feat_struc.reshape(M, E).astype(jnp.float32),
                ((0, Mp - M), (0, Ep - E)))
    c = jnp.pad(feat_context.reshape(M, E).astype(jnp.float32),
                ((0, Mp - M), (0, Ep - E)))
    wf = jnp.pad(Wf.astype(jnp.bfloat16), ((0, Ep - E), (0, Ep - E)))
    bfp = jnp.pad(bf.astype(jnp.float32), (0, Ep - E)).reshape(1, Ep)
    wl = jnp.pad(Wl.astype(jnp.bfloat16), ((0, Ep - E), (0, Ep - E)))
    blp = jnp.pad(bl.astype(jnp.float32), (0, Ep - E)).reshape(1, Ep)

    pair, y = pl.pallas_call(
        functools.partial(_enhance_reason_kernel, n_layers=n_layers),
        out_shape=(jax.ShapeDtypeStruct((Mp, Ep), jnp.float32),
                   jax.ShapeDtypeStruct((Mp, Ep), jnp.float32)),
        grid=(Mp // tm,),
        in_specs=[
            pl.BlockSpec((tm, Ep), lambda i: (i, 0)),
            pl.BlockSpec((tm, Ep), lambda i: (i, 0)),
            pl.BlockSpec((Ep, Ep), lambda i: (0, 0)),
            pl.BlockSpec((1, Ep), lambda i: (0, 0)),
            pl.BlockSpec((Ep, Ep), lambda i: (0, 0)),
            pl.BlockSpec((1, Ep), lambda i: (0, 0)),
        ],
        out_specs=(pl.BlockSpec((tm, Ep), lambda i: (i, 0)),
                   pl.BlockSpec((tm, Ep), lambda i: (i, 0))),
        compiler_params=pltpu.CompilerParams(
            dimension_semantics=("parallel",),
            vmem_limit_bytes=_VMEM_LIMIT),
    )(s, c, wf, bfp, wl, blp)
    pair = pair[:M, :E].reshape(B, N, E)
    y = y[:M, :E].reshape(B, N, E)
    return pair, y


def _mul_kernel(a_ref, b_ref, o_ref):
    o_ref[...] = a_ref[...] * b_ref[...]


def pallas_mul(a, b, tm_target=512):
    """Row-tiled elementwise product (used for the gathered pair features)."""
    M, F = a.shape
    Fp = _round_up(F, 128)              # lane-dense stores
    tm, Mp = _tile_and_pad(M, tm_target, 8)
    ap = jnp.pad(a.astype(jnp.float32), ((0, Mp - M), (0, Fp - F)))
    bp = jnp.pad(b.astype(jnp.float32), ((0, Mp - M), (0, Fp - F)))
    out = pl.pallas_call(
        _mul_kernel,
        out_shape=jax.ShapeDtypeStruct((Mp, Fp), jnp.float32),
        grid=(Mp // tm,),
        in_specs=[
            pl.BlockSpec((tm, Fp), lambda i: (i, 0)),
            pl.BlockSpec((tm, Fp), lambda i: (i, 0)),
        ],
        out_specs=pl.BlockSpec((tm, Fp), lambda i: (i, 0)),
        compiler_params=pltpu.CompilerParams(
            dimension_semantics=("parallel",),
            vmem_limit_bytes=_VMEM_LIMIT),
    )(ap, bp)
    return out[:M, :F]


# ----------------------------------------------------------------------------
# Forward-pass building blocks (Python glue mirrors the reference control flow)
# ----------------------------------------------------------------------------
def make_graph(seq, attn, entity_pos, link_pos, nodes_info, type_table, offset=1):
    """Mirrors DocREModel.make_graph (bert offset=1); test positions are in-range."""
    nodes_batch, entity_att_batch, entity_node_batch = [], [], []
    mention_att_batch, mention_pos_batch = [], []
    for i in range(len(entity_pos)):
        entity_nodes, mention_nodes, link_nodes = [], [], []
        entity_att, mention_att, mention_pos = [], [], []
        for (start, end) in link_pos[i]:
            s, e = start + offset, end + offset
            link_tok = seq[i, s:e]                          # (l, E)
            link_att = attn[i, :, s:e, s:e].mean(0)         # (l, l)
            link_nodes.append((link_att @ link_tok).mean(0))
        for ent in entity_pos[i]:
            mention_pos.append(len(mention_att))
            if len(ent) > 1:
                m_emb, e_att = [], []
                for (start, end, *_rest) in ent:
                    tok = seq[i, start + offset]
                    mention_nodes.append(tok)
                    m_emb.append(tok)
                    a = attn[i, :, start + offset]
                    e_att.append(a)
                    mention_att.append(a)
                m_emb = jax.scipy.special.logsumexp(jnp.stack(m_emb, 0), axis=0)
                e_att = jnp.stack(e_att, 0).mean(0)
            else:
                start = ent[0][0]
                tok = seq[i, start + offset]
                mention_nodes.append(tok)
                m_emb = tok
                e_att = attn[i, :, start + offset]
                mention_att.append(e_att)
            entity_nodes.append(m_emb)
            entity_att.append(e_att)
        mention_pos.append(len(mention_att))

        entity_att = jnp.stack(entity_att, 0)        # (Ne, h, c)
        entity_nodes = jnp.stack(entity_nodes, 0)    # (Ne, E)
        mention_nodes = jnp.stack(mention_nodes, 0)  # (Nm, E)
        mention_att = jnp.stack(mention_att, 0)      # (Nm, h, c)
        link_nodes = jnp.stack(link_nodes, 0)        # (Nl, E)
        nodes = jnp.concatenate([entity_nodes, mention_nodes, link_nodes], 0)
        node_types = type_table[nodes_info[i][:, 6]]          # EmbedLayer lookup
        nodes = jnp.concatenate([nodes, node_types], 1)
        nodes_batch.append(nodes)
        entity_att_batch.append(entity_att)
        entity_node_batch.append(entity_nodes)
        mention_att_batch.append(mention_att)
        mention_pos_batch.append(mention_pos)

    n_max = max(nb.shape[0] for nb in nodes_batch)
    nodes_batch = jnp.stack(
        [jnp.pad(nb, ((0, n_max - nb.shape[0]), (0, 0))) for nb in nodes_batch], 0)
    return (nodes_batch, entity_att_batch, entity_node_batch,
            mention_att_batch, mention_pos_batch)


def relation_map(gcn_nodes, entity_att, entity_pos, seq, mention_att):
    """Batched: all per-document attention->context matmuls in ONE pallas_bmm."""
    nodes = gcn_nodes[-1]
    B = len(entity_pos)
    e_num_max = max(len(e) for e in entity_pos)
    m_num_max = max(m.shape[0] for m in mention_att)

    def pad_rows(x, n):
        return jnp.pad(x, ((0, n - x.shape[0]), (0, 0)))

    att_rows, entity_s, mention_s = [], [], []
    for i in range(B):
        e_num = len(entity_pos[i])
        m_num = mention_att[i].shape[0]
        e_att = entity_att[i].mean(1)                              # (Ne, L)
        e_att = e_att / (e_att.sum(1, keepdims=True) + 1e-5)
        m_att = mention_att[i].mean(1)                             # (Nm, L)
        m_att = m_att / (m_att.sum(1, keepdims=True) + 1e-5)
        att_rows.append(jnp.concatenate(
            [pad_rows(e_att, e_num_max), pad_rows(m_att, m_num_max)], 0))
        entity_s.append(pad_rows(nodes[i][:e_num], e_num_max))
        mention_s.append(pad_rows(nodes[i][e_num:e_num + m_num], m_num_max))

    att = jnp.stack(att_rows, 0)                 # (B, Ne_max+Nm_max, L)
    ctx = pallas_bmm(att, seq)                   # (B, Ne_max+Nm_max, E)
    entity_c = ctx[:, :e_num_max]
    mention_c = ctx[:, e_num_max:]
    return entity_c, jnp.stack(entity_s), mention_c, jnp.stack(mention_s)


def atloss_get_label(logits):
    # TODO(synk): ATLoss definition not in the given source; standard ATLOP
    # threshold-class (class 0) labelling is used for get_label.
    th = logits[:, 0:1]
    out = (logits > th).astype(jnp.float32)
    none_row = (out.sum(axis=1) == 0.0).astype(jnp.float32)
    return out.at[:, 0].set(none_row)


def docre_forward(params, seq_raw, attn, entity_pos, hts, link_pos, nodes_info):
    # TODO(synk): self.encode (transformer + process_long_input) is an external
    # pretrained model; seq_raw / attn stand in for its outputs.
    B, L, H = seq_raw.shape
    E = params["W_trans"].shape[1]

    # extractor_trans (tiled bf16 MXU matmul, f32 accumulation)
    seq = pallas_linear(seq_raw.reshape(B * L, H),
                        params["W_trans"], params["b_trans"]).reshape(B, L, E)

    nodes, entity_att, _ent_nodes, mention_att, mentions_pos = make_graph(
        seq, attn, entity_pos, link_pos, nodes_info, params["type_emb"])

    # TODO(synk): DREMModel (rgat) definition not provided; substituted with two
    # deterministic Pallas linear+ReLU layers of matching I/O dims (adjacency ignored).
    Bn, Nn, D0 = nodes.shape
    g1 = pallas_linear(nodes.reshape(Bn * Nn, D0), params["W_g1"], params["b_g1"],
                       activation="relu").reshape(Bn, Nn, E)
    g2 = pallas_linear(g1.reshape(Bn * Nn, E), params["W_g2"], params["b_g2"],
                       activation="relu").reshape(Bn, Nn, E)
    gcn_nodes = [g1, g2]

    entity_c, entity_s, mention_c, mention_s = relation_map(
        gcn_nodes, entity_att, entity_pos, seq, mention_att)
    e_num_max = entity_s.shape[1]

    # Enhance_entity / Enhance_mention + Enhance_*_pair reasoning, all in ONE
    # fused kernel launch (entity & mention nodes concatenated on the node axis;
    # both weight matrices stay resident in VMEM; the gated "pair" never
    # round-trips HBM between the gate and the reasoning stack).
    s_all = jnp.concatenate([entity_s, mention_s], axis=1)
    c_all = jnp.concatenate([entity_c, mention_c], axis=1)
    pair_all, y_all = pallas_enhance_and_reason(
        s_all, c_all, params["W_fusion"], params["b_fusion"],
        params["W_lstm"], params["b_lstm"])
    entity_pair = pair_all[:, :e_num_max]          # needed for sc_feature_e
    y_e = y_all[:, :e_num_max]                     # E_entity_pair features
    y_m = y_all[:, e_num_max:]                     # E_mention_pair features
    # (the unused mention_pair 'ijk,ilk->ikjl' map is dropped entirely)

    nodes_re = jnp.concatenate([gcn_nodes[0], gcn_nodes[-1]], axis=-1)  # (B, Nn, 2E)

    # The 'ijk,ilk->ikjl' pair maps are NOT materialized: every downstream use is
    # a gathered row product, and the r_v2 block mean factorizes into the product
    # of per-entity mention means.
    left_feats, right_feats, entity_h, entity_t = [], [], [], []
    for i in range(len(entity_pos)):
        ht = jnp.asarray(hts[i], dtype=jnp.int32)     # (P, 2)
        h_idx, t_idx = ht[:, 0], ht[:, 1]
        mp = mentions_pos[i]
        e_num = len(entity_pos[i])
        # per-entity mean of mention reasoning features (static slices)
        ent_m_mean = jnp.stack([y_m[i, mp[e]:mp[e + 1]].mean(axis=0)
                                for e in range(e_num)], axis=0)       # (Ne, E)
        # [r_v1 | r_v2 | sc_feature_e] factors: left * right (done in one kernel)
        left_feats.append(jnp.concatenate(
            [jnp.take(y_e[i], h_idx, axis=0),
             jnp.take(ent_m_mean, h_idx, axis=0),
             jnp.take(entity_pair[i], h_idx, axis=0)], axis=-1))
        right_feats.append(jnp.concatenate(
            [jnp.take(y_e[i], t_idx, axis=0),
             jnp.take(ent_m_mean, t_idx, axis=0),
             jnp.take(entity_pair[i], t_idx, axis=0)], axis=-1))
        entity_h.append(jnp.take(nodes_re[i], h_idx, axis=0))
        entity_t.append(jnp.take(nodes_re[i], t_idx, axis=0))

    left = jnp.concatenate(left_feats, 0)      # (P_total, 3E)
    right = jnp.concatenate(right_feats, 0)
    pair_feat = pallas_mul(left, right)        # == [r_v1 | r_v2 | sc_feature_e]

    entity_h = jnp.concatenate(entity_h, 0)    # (P_total, 2E)
    entity_t = jnp.concatenate(entity_t, 0)

    entity_ht = pallas_linear(jnp.concatenate([entity_h, entity_t], -1),
                              params["W_ht"], params["b_ht"])          # (P, 2E)
    rel_in = jnp.concatenate([pair_feat, entity_ht], -1)               # (P, 5E)
    relation_rep = pallas_linear(rel_in, params["W_mip"], params["b_mip"])
    relation_rep = pallas_linear(relation_rep, params["W_mip2"], params["b_mip2"],
                                 activation="tanh")
    logits = pallas_linear(relation_rep, params["W_bil"], params["b_bil"])
    preds = atloss_get_label(logits)
    return logits, preds


# ----------------------------------------------------------------------------
# Deterministic parameter init (shapes follow DocREModel.__init__, small dims)
# ----------------------------------------------------------------------------
def init_params(key, H, E, TD, num_class):
    ks = jax.random.split(key, 10)
    w = lambda k, s: jax.random.normal(k, s, jnp.float32) * 0.05
    z = lambda n: jnp.zeros((n,), jnp.float32)
    return {
        "W_trans": w(ks[0], (H, E)), "b_trans": z(E),           # extractor_trans
        "type_emb": w(ks[1], (3, TD)),                          # EmbedLayer(3, TD)
        "W_g1": w(ks[2], (E + TD, E)), "b_g1": z(E),            # rgat substitute
        "W_g2": w(ks[3], (E, E)), "b_g2": z(E),
        "W_fusion": w(ks[4], (E, E)), "b_fusion": z(E),         # BiLstm_reason substitute
        "W_lstm": w(ks[5], (E, E)), "b_lstm": z(E),             # lstm_reason_e substitute
        "W_ht": w(ks[6], (4 * E, 2 * E)), "b_ht": z(2 * E),     # ht_extractor
        "W_mip": w(ks[7], (5 * E, 4 * E)), "b_mip": z(4 * E),   # MIP_Linear
        "W_mip2": w(ks[8], (4 * E, 2 * E)), "b_mip2": z(2 * E),  # MIP_Linear2
        "W_bil": w(ks[9], (2 * E, num_class)), "b_bil": z(num_class),  # bilinear
    }


if __name__ == "__main__":
    B, L, H, E, TD, HEADS, NUM_CLASS = 2, 16, 32, 64, 20, 4, 5

    key = jax.random.PRNGKey(0)
    k_p, k_s, k_a = jax.random.split(key, 3)
    params = init_params(k_p, H, E, TD, NUM_CLASS)

    # synthetic encoder outputs (see TODO(synk) on encode)
    seq_raw = jax.random.normal(k_s, (B, L, H), jnp.float32)
    attn = jax.nn.softmax(jax.random.normal(k_a, (B, HEADS, L, L), jnp.float32), axis=-1)

    # per-document graph metadata (python data, like the reference)
    # entity 0 has 2 mentions, entities 1 and 2 have 1 mention each
    one_doc_entities = [
        [(1, 2, 0, 0, 0, 0), (5, 6, 0, 0, 0, 1)],
        [(3, 4, 1, 0, 0, 0)],
        [(8, 9, 2, 0, 0, 1)],
    ]
    entity_pos = [one_doc_entities, one_doc_entities]
    link_pos = [[(0, 6), (6, 12)], [(0, 6), (6, 12)]]
    # nodes = 3 entities + 4 mentions + 2 links = 9; column 6 is the node type
    node_types = jnp.asarray([0, 0, 0, 1, 1, 1, 1, 2, 2], jnp.int32)
    ninfo = jnp.concatenate([jnp.zeros((9, 6), jnp.int32), node_types[:, None]], axis=1)
    nodes_info = [ninfo, ninfo]
    hts = [[(h, t) for h in range(3) for t in range(3) if h != t] for _ in range(B)]

    logits, preds = docre_forward(params, seq_raw, attn, entity_pos, hts,
                                  link_pos, nodes_info)
    jax.block_until_ready((logits, preds))
    assert logits.shape == (12, NUM_CLASS) and preds.shape == (12, NUM_CLASS)
    print("KERNEL_OK")
</pallas_src>

<mosaic_0001>
module attributes {stable_mosaic.version = 11 : i64} {
  func.func @_linear_kernel(%arg0: i32, %arg1: i32, %arg2: i32, %arg3: memref<32x128xbf16, #tpu.memory_space<vmem>>, %arg4: memref<128x128xbf16, #tpu.memory_space<vmem>>, %arg5: memref<1x128xf32, #tpu.memory_space<vmem>>, %arg6: memref<32x128xf32, #tpu.memory_space<vmem>>, %arg7: memref<32x128xf32, #tpu.memory_space<vmem>>) attributes {dimension_semantics = [#tpu.dimension_semantics<parallel>, #tpu.dimension_semantics<parallel>, #tpu.dimension_semantics<arbitrary>], iteration_bounds = array<i64: 1, 1, 1>, scalar_prefetch = 0 : i64, scratch_operands = 1 : i64, tpu.core_type = #tpu.core_type<tc>, window_params = [{transform_indices = @transform_0, window_bounds = array<i64: 32, 128>}, {transform_indices = @transform_1, window_bounds = array<i64: 128, 128>}, {transform_indices = @transform_2, window_bounds = array<i64: 1, 128>}, {transform_indices = @transform_3, window_bounds = array<i64: 32, 128>}]} {
    %c0_i32 = arith.constant 0 : i32
    %0 = arith.cmpi eq, %arg2, %c0_i32 : i32
    %1 = arith.extui %0 : i1 to i32
    %c0_i32_0 = arith.constant 0 : i32
    %2 = arith.cmpi ne, %1, %c0_i32_0 : i32
    scf.if %2 {
      %cst_10 = arith.constant 0.000000e+00 : f32
      %12 = vector.broadcast %cst_10 : f32 to vector<32x128xf32>
      %c0_11 = arith.constant 0 : index
      %c0_12 = arith.constant 0 : index
      %13 = vector.load %arg7[%c0_11, %c0_12] : memref<32x128xf32, #tpu.memory_space<vmem>>, vector<32x128xf32>
      tpu.vector_store %arg7[%c0_11, %c0_12], %12 {strides = array<i32>} : memref<32x128xf32, #tpu.memory_space<vmem>>, vector<32x128xf32>,
    } else {
    }
    %c0 = arith.constant 0 : index
    %c0_1 = arith.constant 0 : index
    %3 = vector.load %arg7[%c0, %c0_1] : memref<32x128xf32, #tpu.memory_space<vmem>>, vector<32x128xf32>
    %c0_2 = arith.constant 0 : index
    %c0_3 = arith.constant 0 : index
    %4 = vector.load %arg3[%c0_2, %c0_3] : memref<32x128xbf16, #tpu.memory_space<vmem>>, vector<32x128xbf16>
    %c0_4 = arith.constant 0 : index
    %c0_5 = arith.constant 0 : index
    %5 = vector.load %arg4[%c0_4, %c0_5] : memref<128x128xbf16, #tpu.memory_space<vmem>>, vector<128x128xbf16>
    %cst = arith.constant dense<0.000000e+00> : vector<32x128xf32>
    %6 = tpu.matmul %4, %5, %cst {dimension_numbers = #tpu.dot_dimension_numbers<[1], [0], [0], [1], [0, 0, 1, 1], [], []>} : vector<32x128xbf16>, vector<128x128xbf16>, vector<32x128xf32> -> vector<32x128xf32>
    %7 = arith.addf %3, %6 : vector<32x128xf32>
    %c0_6 = arith.constant 0 : index
    %c0_7 = arith.constant 0 : index
    %8 = vector.load %arg7[%c0_6, %c0_7] : memref<32x128xf32, #tpu.memory_space<vmem>>, vector<32x128xf32>
    tpu.vector_store %arg7[%c0_6, %c0_7], %7 {strides = array<i32>} : memref<32x128xf32, #tpu.memory_space<vmem>>, vector<32x128xf32>,
    %c0_i32_8 = arith.constant 0 : i32
    %9 = arith.cmpi eq, %arg2, %c0_i32_8 : i32
    %10 = arith.extui %9 : i1 to i32
    %c0_i32_9 = arith.constant 0 : i32
    %11 = arith.cmpi ne, %10, %c0_i32_9 : i32
    scf.if %11 {
      %c0_10 = arith.constant 0 : index
      %c0_11 = arith.constant 0 : index
      %12 = vector.load %arg7[%c0_10, %c0_11] : memref<32x128xf32, #tpu.memory_space<vmem>>, vector<32x128xf32>
      %c0_12 = arith.constant 0 : index
      %c0_13 = arith.constant 0 : index
      %13 = vector.load %arg5[%c0_12, %c0_13] : memref<1x128xf32, #tpu.memory_space<vmem>>, vector<1x128xf32>
      %14 = vector.broadcast %13 : vector<1x128xf32> to vector<32x128xf32>
      %15 = arith.addf %12, %14 : vector<32x128xf32>
      %c0_14 = arith.constant 0 : index
      %c0_15 = arith.constant 0 : index
      %16 = vector.load %arg6[%c0_14, %c0_15] : memref<32x128xf32, #tpu.memory_space<vmem>>, vector<32x128xf32>
      tpu.vector_store %arg6[%c0_14, %c0_15], %15 {strides = array<i32>} : memref<32x128xf32, #tpu.memory_space<vmem>>, vector<32x128xf32>,
    } else {
    }
    return
  }
  func.func @transform_0(%arg0: i32, %arg1: i32, %arg2: i32) -> (i32, i32) {
    %c0_i32 = arith.constant 0 : i32
    return %arg0, %arg2 : i32, i32
  }
  func.func @transform_1(%arg0: i32, %arg1: i32, %arg2: i32) -> (i32, i32) {
    %c0_i32 = arith.constant 0 : i32
    return %arg2, %arg1 : i32, i32
  }
  func.func @transform_2(%arg0: i32, %arg1: i32, %arg2: i32) -> (i32, i32) {
    %c0_i32 = arith.constant 0 : i32
    %c0_i32_0 = arith.constant 0 : i32
    return %c0_i32, %arg1 : i32, i32
  }
  func.func @transform_3(%arg0: i32, %arg1: i32, %arg2: i32) -> (i32, i32) {
    %c0_i32 = arith.constant 0 : i32
    return %arg0, %arg1 : i32, i32
  }
}

</mosaic_0001>

<bundles_post_ra>
// kernel: tpu_custom_call.1
= control target key start
LH: loop header
LB: loop body
LE: loop exit
PB: predicated region body
PF: predicated region fallthrough
CT: control target
= control target key end

     0   :  { %8 = vsyncpa [#allocation4], 0  ;;  %s396_s0 = inlined_call_operand.hbm [shape: bf16[32,128], index: 0, kind: input, shape index: {}]   ;;  %s397_s1 = inlined_call_operand.hbm [shape: bf16[128,128], index: 1, kind: input, shape index: {}]   ;;  %s398_s2 = inlined_call_operand.vmem [shape: f32[1,128], index: 2, kind: input, shape index: {}]   ;;  %s399_s3 = inlined_call_operand.hbm [shape: f32[32,128], index: 3, kind: output, shape index: {}]  }
   0x1   :  { %9 = vsyncpa [#allocation7], 0 }
   0x2   :  { %10 = vsyncpa [#allocation5], 0  ;;  %s357_s12 = smov [#allocation3]  }
   0x3   :  { %s16_s13 = sshll.u32 %s357_s12, 4  ;;  %s17_s13 = int_to_ptr.vmem [resolvable:$true] %s16_s13 }
   0x4   :  { %s299_s14 = scalar_lea.vmem %s17_s13, 256  ;;  %p304_p1 = scmp.lt.s32.totalorder %s17_s13, %s17_s13 }
   0x5   :  { %p300_p0 = scmp.ne.s32.totalorder %s17_s13, %s299_s14  ;;  %p305_p2 = scmp.lt.s32.totalorder %s299_s14, %s299_s14 }
   0x7   :  { %p306_p3 = por %p305_p2, %p304_p1 }
   0x9   :  { %p307_p4 = pnand %p306_p3, %p300_p0 }
   0xb   :  { %310 = shalt.err (!%p307_p4)
}
   0xc   :  { %s358_s15 = smov 64   ;;  %s359_s16 = smov 4  }
   0xd   :  { %22 = dma.hbm_to_vmem [thread:$0]  %s396_s0, 256, %s17_s13, [#allocation4], %s358_s15, %s358_s15, %s359_s16  }
   0xe   :  { %s360_s19 = smov [#allocation6]  }
   0xf   :  { %s28_s20 = sshll.u32 %s360_s19, 4  ;;  %s29_s20 = int_to_ptr.vmem [resolvable:$true] %s28_s20 }
  0x10   :  { %s319_s21 = scalar_lea.vmem %s29_s20, 1024  ;;  %p324_p6 = scmp.lt.s32.totalorder %s29_s20, %s29_s20 }
  0x11   :  { %p320_p5 = scmp.ne.s32.totalorder %s29_s20, %s319_s21  ;;  %p325_p7 = scmp.lt.s32.totalorder %s319_s21, %s319_s21 }
  0x13   :  { %p326_p8 = por %p325_p7, %p324_p6 }
  0x15   :  { %p327_p9 = pnand %p326_p8, %p320_p5 }
  0x17   :  { %330 = shalt.err (!%p327_p9)
}
  0x18   :  { %34 = dma.hbm_to_vmem [thread:$0]  %s397_s1, 1024, %s29_s20, [#allocation7], %s358_s15, %s358_s15, %s359_s16  }
  0x19   :  { %351 = dma.done.wait [#allocation4], 256  }
  0x1a   :  { %352 = vsyncadd [#allocation4], 4294967040 }
  0x1b   :  { %353 = dma.done.wait [#allocation7], 1024  }
  0x1c   :  { %354 = vsyncadd [#allocation7], 4294966272  ;;  %v281_v0 = vld [vmem:[#allocation6 + $0x38] sm:$0xff]   ;;  %v282_v1 = vld [vmem:[#allocation6 + $0x30] sm:$0xff]   ;;  %s361_s24 = smov [#allocation8]  }
  0x1d   :  { %254 = vmatprep.subr.bf16.mxu0 %v281_v0  ;;  %v283_v2 = vld [vmem:[#allocation6 + $0x28] sm:$0xff]   ;;  %v284_v3 = vld [vmem:[#allocation6 + $0x20] sm:$0xff]   ;;  %v289_v4 = vld [vmem:[#allocation3] sm:$0xff]   ;;  %s220_s25 = sshll.u32 %s361_s24, 4  ;;  %s221_s25 = int_to_ptr.vmem [resolvable:$true] %s220_s25 }
  0x1e   :  { %255 = vmatpush3.bf16.msra.mxu0 %v281_v0  ;;  %270 = vmatprep.mubr.bf16.mxu0 %v289_v4  ;;  %v285_v5 = vld [vmem:[#allocation6 + $0x18] sm:$0xff]   ;;  %v286_v6 = vld [vmem:[#allocation6 + $0x10] sm:$0xff]   ;;  %v287_v7 = vld [vmem:[#allocation6 + $0x8] sm:$0xff]   ;;  %s331_s26 = scalar_lea.vmem %s221_s25, 512  ;;  %p336_p11 = scmp.lt.s32.totalorder %s221_s25, %s221_s25 }
  0x1f   :  { %256 = vmatprep.subr.bf16.mxu0 %v282_v1  ;;  %v288_v8 = vld [vmem:[#allocation6] sm:$0xff]   ;;  %v290_v9 = vld [vmem:[#allocation3 + $0x8] sm:$0xff]   ;;  %v243_v10 = vld [vmem:[%s398_s2] ss:$0 sm:$0xff]  ;;  %p332_p10 = scmp.ne.s32.totalorder %s221_s25, %s331_s26  ;;  %p337_p12 = scmp.lt.s32.totalorder %s331_s26, %s331_s26 }
  0x21   :  { %p338_p13 = por %p337_p12, %p336_p11 }
  0x22   :  { %257 = vmatpush3.bf16.msra.mxu0 %v282_v1 }
  0x23   :  { %258 = vmatprep.subr.bf16.mxu0 %v283_v2  ;;  %p339_p0 = pnand %p338_p13, %p332_p10 }
  0x26   :  { %259 = vmatpush3.bf16.msra.mxu0 %v283_v2 }
  0x27   :  { %260 = vmatprep.subr.bf16.mxu0 %v284_v3 }
  0x2a   :  { %261 = vmatpush3.bf16.msra.mxu0 %v284_v3 }
  0x2b   :  { %262 = vmatprep.subr.bf16.mxu0 %v285_v5 }
  0x2e   :  { %263 = vmatpush3.bf16.msra.mxu0 %v285_v5 }
  0x2f   :  { %264 = vmatprep.subr.bf16.mxu0 %v286_v6 }
  0x32   :  { %265 = vmatpush3.bf16.msra.mxu0 %v286_v6 }
  0x33   :  { %266 = vmatprep.subr.bf16.mxu0 %v287_v7 }
  0x36   :  { %267 = vmatpush3.bf16.msra.mxu0 %v287_v7 }
  0x37   :  { %268 = vmatprep.subr.bf16.mxu0 %v288_v8 }
  0x3a   :  { %269 = vmatpush3.bf16.msra.mxu0 %v288_v8 }
  0x3d   :  { %271 = vmatmul.mubr.bf16.vlgmr.msra.gmra.mxu0 %v290_v9 }
  0xfd   :  { %v272_v11 = vpop.f32.mrf.mxu0 }
  0xfe   :  { %v209_v12 = vadd.f32 %v272_v11, %v243_v10 }
  0xff   :  { %v170_v13 = vpop.f32.mrf.mxu0 }
 0x100   :  { %213 = vst [vmem:[#allocation8 + $0x10] sm:$0xff] %v209_v12  ;;  %v207_v14 = vadd.f32 %v243_v10, %v170_v13 }
 0x101   :  { %v273_v15 = vpop.f32.mrf.mxu0 }
 0x102   :  { %211 = vst [vmem:[#allocation8] sm:$0xff] %v207_v14  ;;  %v210_v16 = vadd.f32 %v273_v15, %v243_v10 }
 0x103   :  { %v173_v17 = vpop.f32.mrf.mxu0 }
 0x104   :  { %214 = vst [vmem:[#allocation8 + $0x18] sm:$0xff] %v210_v16  ;;  %v208_v18 = vadd.f32 %v243_v10, %v173_v17 }
 0x106   :  { %212 = vst [vmem:[#allocation8 + $0x8] sm:$0xff] %v208_v18 }
 0x107   :  { %342 = shalt.err (!%p339_p0)
}
 0x108   :  { %s362_s2 = smov 128   ;;  %s363_s27 = smov 8  }
 0x109   :  { %226 = dma.vmem_to_hbm [thread:$0]  %s221_s25, 512, %s399_s3, [#allocation5], %s362_s2, %s362_s2, %s363_s27  }
 0x10a   :  { %355 = dma.done.wait [#allocation5], 512  }
 0x10b   :  { %356 = vsyncadd [#allocation5], 4294966784 }
 0x10c   :  { %230 = vsyncpa [#allocation4], 1 }
 0x10d   :  { %231 = vsyncpa [#allocation7], 1 }
 0x10e   :  { %232 = vsyncpa [#allocation5], 1 }

</bundles_post_ra>
